<compile_context>
chip_gen: v7x
topology: tpu7x:2x2x1
jax: 0.10.0
libtpu: 0.0.40
codegen_flags: <defaults>
</compile_context>

<pallas_src>
import functools

import jax
import jax.numpy as jnp
from jax.experimental import pallas as pl
from jax.experimental.pallas import tpu as pltpu

_LANE = 128
_SUBLANE = 8
_TARGET_BLOCK_BYTES = 2 * 1024 * 1024  # per-input block size target (~2 MiB)


def _round_up(v, m):
    return ((v + m - 1) // m) * m


def _num_tensorcores_per_device():
    """2 for chips with two TensorCores behind one device (v4/v5p/v7x), else 1."""
    try:
        kind = jax.devices()[0].device_kind.lower()
    except Exception:
        return 1
    return 2 if any(tag in kind for tag in ("v7", "7x", "v5p", "v4")) else 1


def _mse_kernel(x_ref, y_ref, o_ref, acc_ref, *, valid_rows, inv_n):
    c = pl.program_id(0)            # partial-sum axis ("parallel"; per-TC split)
    k = pl.program_id(1)            # reduction axis ("arbitrary")
    inner = pl.num_programs(1)
    block_rows = x_ref.shape[0]

    @pl.when(k == 0)
    def _init():
        acc_ref[...] = jnp.zeros_like(acc_ref)

    d = x_ref[...].astype(jnp.float32) - y_ref[...].astype(jnp.float32)
    sq = d * d
    fold = (block_rows // _SUBLANE, _SUBLANE, _LANE)

    row0 = (c * inner + k) * block_rows
    block_is_full = row0 + block_rows <= valid_rows

    # Steady state: no iota / compare / select — pure VALU fold into the vreg acc.
    @pl.when(block_is_full)
    def _accumulate_full():
        acc_ref[...] += jnp.sum(sq.reshape(fold), axis=0)

    # Only the last partial block (and any clamped trailing iteration of the
    # core split) pays for row masking.
    @pl.when(jnp.logical_not(block_is_full))
    def _accumulate_masked():
        row_ids = row0 + jax.lax.broadcasted_iota(jnp.int32, sq.shape, 0)
        masked = jnp.where(row_ids < valid_rows, sq, 0.0)
        acc_ref[...] += jnp.sum(masked.reshape(fold), axis=0)

    @pl.when(k == inner - 1)
    def _finalize():
        o_ref[...] = acc_ref[...] * jnp.float32(inv_n)


def mse_loss(inputs, targets, block_rows=None):
    """Pallas equivalent of nn.MSELoss()(inputs, targets) (mean reduction)."""
    assert inputs.shape == targets.shape, "MSELoss expects matching shapes"
    out_dtype = jnp.promote_types(inputs.dtype, targets.dtype)
    n = inputs.size
    if n == 0:
        # torch returns NaN for empty tensors
        return jnp.array(jnp.nan, dtype=out_dtype)

    inv_n = 1.0 / float(n)  # exact integer -> f64 reciprocal (safe for n > 2^24)

    x = inputs.reshape(-1)
    y = targets.reshape(-1)

    rows = n // _LANE
    main = rows * _LANE
    tail = n - main

    # Ragged (<128-element) tail handled by a tiny jnp epilogue — no full-array pad.
    if tail:
        tx = x[main:].astype(jnp.float32)
        ty = y[main:].astype(jnp.float32)
        tail_term = jnp.sum((tx - ty) ** 2) * jnp.float32(inv_n)
    else:
        tail_term = jnp.float32(0.0)

    if rows == 0:
        return tail_term.astype(out_dtype)

    assert rows < 2**31, "int32 row-index arithmetic in the kernel would overflow"

    # TODO(synk): for ragged sizes the prefix slice below may materialize a copy
    # of the bulk data; a manual-DMA tail path would avoid it.
    x2 = (x if tail == 0 else x[:main]).reshape(rows, _LANE)
    y2 = (y if tail == 0 else y[:main]).reshape(rows, _LANE)

    itemsize = max(jnp.dtype(inputs.dtype).itemsize, jnp.dtype(targets.dtype).itemsize)
    if block_rows is None:
        block_rows = max(_SUBLANE, _TARGET_BLOCK_BYTES // (_LANE * itemsize))
    block_rows = min(block_rows, rows)
    block_rows = max(_SUBLANE, _round_up(block_rows, _SUBLANE))

    n_blocks = pl.cdiv(rows, block_rows)

    # 2-way partial-sum split only where there are 2 TensorCores to use it.
    if _num_tensorcores_per_device() >= 2 and n_blocks >= 2:
        n_out, inner = 2, pl.cdiv(n_blocks, 2)
    else:
        n_out, inner = 1, n_blocks

    last_block = n_blocks - 1

    def block_map(c, k):
        # Clamp so any (fully masked) trailing iteration of the core split
        # never indexes out of range; a no-op when n_out == 1.
        return (jnp.minimum(c * inner + k, last_block), 0)

    bytes_in = main * (jnp.dtype(inputs.dtype).itemsize
                       + jnp.dtype(targets.dtype).itemsize)
    cost = pl.CostEstimate(
        flops=3 * main,
        transcendentals=0,
        bytes_accessed=bytes_in + n_out * _SUBLANE * _LANE * 4,
    )

    partials = pl.pallas_call(
        functools.partial(_mse_kernel, valid_rows=rows, inv_n=inv_n),
        out_shape=jax.ShapeDtypeStruct((n_out, _SUBLANE, _LANE), jnp.float32),
        grid_spec=pltpu.PrefetchScalarGridSpec(
            num_scalar_prefetch=0,
            grid=(n_out, inner),
            in_specs=[
                pl.BlockSpec((block_rows, _LANE), block_map),
                pl.BlockSpec((block_rows, _LANE), block_map),
            ],
            out_specs=pl.BlockSpec((None, _SUBLANE, _LANE), lambda c, k: (c, 0, 0)),
            scratch_shapes=[pltpu.VMEM((_SUBLANE, _LANE), jnp.float32)],
        ),
        compiler_params=pltpu.CompilerParams(
            # TODO(synk): on v7x, CORE_PARALLEL on axis 0 would *guarantee* the
            # 2-way partial split lands on both TensorCores; "parallel" is kept
            # here for portability across Mosaic versions.
            dimension_semantics=("parallel", "arbitrary"),
        ),
        cost_estimate=cost,
    )(x2, y2)

    total = jnp.sum(partials) + tail_term
    return total.astype(out_dtype)


if __name__ == "__main__":
    key = jax.random.PRNGKey(0)
    k1, k2, k3, k4, k5, k6 = jax.random.split(key, 6)

    # Primary test: small NCHW tensors (batch=2, channels=4, 16x16 spatial).
    inputs = jax.random.normal(k1, (2, 4, 16, 16), dtype=jnp.float32)
    targets = jax.random.normal(k2, (2, 4, 16, 16), dtype=jnp.float32)
    mse = mse_loss(inputs, targets)
    jax.block_until_ready(mse)
    ref = jnp.mean((inputs - targets) ** 2)
    assert jnp.allclose(mse, ref, rtol=1e-5, atol=1e-6), (mse, ref)

    # Odd shape: exercises the ragged-tail epilogue, multi-block tiling,
    # accumulation across the reduction axis, and last-partial-block masking.
    a = jax.random.normal(k3, (4, 5, 17, 7), dtype=jnp.float32)
    b = jax.random.normal(k4, (4, 5, 17, 7), dtype=jnp.float32)
    mse2 = mse_loss(a, b, block_rows=8)
    jax.block_until_ready(mse2)
    ref2 = jnp.mean((a - b) ** 2)
    assert jnp.allclose(mse2, ref2, rtol=1e-5, atol=1e-6), (mse2, ref2)

    # Larger input: multiple default-size blocks (and the 2-way split on 2-TC chips).
    c1 = jax.random.normal(k5, (8, 8, 128, 128), dtype=jnp.float32)
    c2 = jax.random.normal(k6, (8, 8, 128, 128), dtype=jnp.float32)
    mse3 = mse_loss(c1, c2)
    jax.block_until_ready(mse3)
    ref3 = jnp.mean((c1 - c2) ** 2)
    assert jnp.allclose(mse3, ref3, rtol=1e-5, atol=1e-6), (mse3, ref3)

    # Native bf16 streaming path (no wrapper upcast).
    ab = inputs.astype(jnp.bfloat16)
    bb = targets.astype(jnp.bfloat16)
    mse4 = mse_loss(ab, bb)
    jax.block_until_ready(mse4)
    ref4 = jnp.mean((ab.astype(jnp.float32) - bb.astype(jnp.float32)) ** 2)
    assert jnp.allclose(mse4.astype(jnp.float32), ref4, rtol=2e-2), (mse4, ref4)

    print("KERNEL_OK")
</pallas_src>

<mosaic_0001>
module attributes {stable_mosaic.version = 11 : i64} {
  func.func @_mse_kernel(%arg0: i32, %arg1: i32, %arg2: memref<16x128xf32, #tpu.memory_space<vmem>>, %arg3: memref<16x128xf32, #tpu.memory_space<vmem>>, %arg4: memref<1x8x128xf32, #tpu.memory_space<vmem>>, %arg5: memref<8x128xf32, #tpu.memory_space<vmem>>) attributes {dimension_semantics = [#tpu.dimension_semantics<parallel>, #tpu.dimension_semantics<arbitrary>], iteration_bounds = array<i64: 1, 1>, scalar_prefetch = 0 : i64, scratch_operands = 1 : i64, tpu.core_type = #tpu.core_type<tc>, window_params = [{transform_indices = @transform_0, window_bounds = array<i64: 16, 128>}, {transform_indices = @transform_1, window_bounds = array<i64: 16, 128>}, {transform_indices = @transform_2, window_bounds = array<i64: 1, 8, 128>}]} {
    %c0_i32 = arith.constant 0 : i32
    %0 = arith.cmpi eq, %arg1, %c0_i32 : i32
    %1 = arith.extui %0 : i1 to i32
    %c0_i32_0 = arith.constant 0 : i32
    %2 = arith.cmpi ne, %1, %c0_i32_0 : i32
    scf.if %2 {
      %cst = arith.constant 0.000000e+00 : f32
      %20 = vector.broadcast %cst : f32 to vector<8x128xf32>
      %c0_10 = arith.constant 0 : index
      %c0_11 = arith.constant 0 : index
      %21 = vector.load %arg5[%c0_10, %c0_11] : memref<8x128xf32, #tpu.memory_space<vmem>>, vector<8x128xf32>
      tpu.vector_store %arg5[%c0_10, %c0_11], %20 {strides = array<i32>} : memref<8x128xf32, #tpu.memory_space<vmem>>, vector<8x128xf32>,
    } else {
    }
    %c0 = arith.constant 0 : index
    %c0_1 = arith.constant 0 : index
    %3 = vector.load %arg2[%c0, %c0_1] : memref<16x128xf32, #tpu.memory_space<vmem>>, vector<16x128xf32>
    %c0_2 = arith.constant 0 : index
    %c0_3 = arith.constant 0 : index
    %4 = vector.load %arg3[%c0_2, %c0_3] : memref<16x128xf32, #tpu.memory_space<vmem>>, vector<16x128xf32>
    %5 = arith.subf %3, %4 : vector<16x128xf32>
    %6 = arith.mulf %5, %5 : vector<16x128xf32>
    %c1_i32 = arith.constant 1 : i32
    %7 = arith.muli %arg0, %c1_i32 : i32
    %8 = arith.addi %7, %arg1 : i32
    %c16_i32 = arith.constant 16 : i32
    %9 = arith.muli %8, %c16_i32 : i32
    %c16_i32_4 = arith.constant 16 : i32
    %10 = arith.addi %9, %c16_i32_4 : i32
    %c16_i32_5 = arith.constant 16 : i32
    %11 = arith.cmpi sle, %10, %c16_i32_5 : i32
    %12 = arith.extui %11 : i1 to i32
    %c0_i32_6 = arith.constant 0 : i32
    %13 = arith.cmpi ne, %12, %c0_i32_6 : i32
    scf.if %13 {
      %c0_10 = arith.constant 0 : index
      %c0_11 = arith.constant 0 : index
      %20 = vector.load %arg5[%c0_10, %c0_11] : memref<8x128xf32, #tpu.memory_space<vmem>>, vector<8x128xf32>
      %21 = vector.shape_cast %6 : vector<16x128xf32> to vector<2x8x128xf32>
      %cst = arith.constant dense<0.000000e+00> : vector<8x128xf32>
      %22 = vector.multi_reduction <add>, %21, %cst [0] : vector<2x8x128xf32> to vector<8x128xf32>
      %23 = arith.addf %20, %22 : vector<8x128xf32>
      %c0_12 = arith.constant 0 : index
      %c0_13 = arith.constant 0 : index
      %24 = vector.load %arg5[%c0_12, %c0_13] : memref<8x128xf32, #tpu.memory_space<vmem>>, vector<8x128xf32>
      tpu.vector_store %arg5[%c0_12, %c0_13], %23 {strides = array<i32>} : memref<8x128xf32, #tpu.memory_space<vmem>>, vector<8x128xf32>,
    } else {
    }
    %true = arith.constant true
    %14 = arith.xori %11, %true : i1
    %15 = arith.extui %14 : i1 to i32
    %c0_i32_7 = arith.constant 0 : i32
    %16 = arith.cmpi ne, %15, %c0_i32_7 : i32
    scf.if %16 {
      %20 = tpu.iota {dimensions = array<i32: 0>} : vector<16x128xi32>
      %21 = vector.broadcast %9 : i32 to vector<16x128xi32>
      %22 = arith.addi %21, %20 : vector<16x128xi32>
      %c16_i32_10 = arith.constant 16 : i32
      %23 = vector.broadcast %c16_i32_10 : i32 to vector<16x128xi32>
      %24 = arith.cmpi slt, %22, %23 : vector<16x128xi32>
      %cst = arith.constant 0.000000e+00 : f32
      %25 = vector.broadcast %cst : f32 to vector<16x128xf32>
      %26 = arith.select %24, %6, %25 : vector<16x128xi1>, vector<16x128xf32>
      %c0_11 = arith.constant 0 : index
      %c0_12 = arith.constant 0 : index
      %27 = vector.load %arg5[%c0_11, %c0_12] : memref<8x128xf32, #tpu.memory_space<vmem>>, vector<8x128xf32>
      %28 = vector.shape_cast %26 : vector<16x128xf32> to vector<2x8x128xf32>
      %cst_13 = arith.constant dense<0.000000e+00> : vector<8x128xf32>
      %29 = vector.multi_reduction <add>, %28, %cst_13 [0] : vector<2x8x128xf32> to vector<8x128xf32>
      %30 = arith.addf %27, %29 : vector<8x128xf32>
      %c0_14 = arith.constant 0 : index
      %c0_15 = arith.constant 0 : index
      %31 = vector.load %arg5[%c0_14, %c0_15] : memref<8x128xf32, #tpu.memory_space<vmem>>, vector<8x128xf32>
      tpu.vector_store %arg5[%c0_14, %c0_15], %30 {strides = array<i32>} : memref<8x128xf32, #tpu.memory_space<vmem>>, vector<8x128xf32>,
    } else {
    }
    %c0_i32_8 = arith.constant 0 : i32
    %17 = arith.cmpi eq, %arg1, %c0_i32_8 : i32
    %18 = arith.extui %17 : i1 to i32
    %c0_i32_9 = arith.constant 0 : i32
    %19 = arith.cmpi ne, %18, %c0_i32_9 : i32
    scf.if %19 {
      %c0_10 = arith.constant 0 : index
      %c0_11 = arith.constant 0 : index
      %20 = vector.load %arg5[%c0_10, %c0_11] : memref<8x128xf32, #tpu.memory_space<vmem>>, vector<8x128xf32>
      %cst = arith.constant 4.8828125E-4 : f32
      %21 = vector.broadcast %cst : f32 to vector<8x128xf32>
      %22 = arith.mulf %20, %21 : vector<8x128xf32>
      %c0_12 = arith.constant 0 : index
      %c0_13 = arith.constant 0 : index
      %c0_14 = arith.constant 0 : index
      %23 = vector.load %arg4[%c0_12, %c0_13, %c0_14] : memref<1x8x128xf32, #tpu.memory_space<vmem>>, vector<1x8x128xf32>
      %24 = vector.shape_cast %23 : vector<1x8x128xf32> to vector<8x128xf32>
      %25 = vector.shape_cast %22 : vector<8x128xf32> to vector<1x8x128xf32>
      tpu.vector_store %arg4[%c0_12, %c0_13, %c0_14], %25 {strides = array<i32>} : memref<1x8x128xf32, #tpu.memory_space<vmem>>, vector<1x8x128xf32>,
    } else {
    }
    return
  }
  func.func @transform_0(%arg0: i32, %arg1: i32) -> (i32, i32) {
    %c1_i32 = arith.constant 1 : i32
    %0 = arith.muli %arg0, %c1_i32 : i32
    %1 = arith.addi %0, %arg1 : i32
    %c0_i32 = arith.constant 0 : i32
    %2 = arith.minsi %1, %c0_i32 : i32
    %c0_i32_0 = arith.constant 0 : i32
    %c0_i32_1 = arith.constant 0 : i32
    return %2, %c0_i32_0 : i32, i32
  }
  func.func @transform_1(%arg0: i32, %arg1: i32) -> (i32, i32) {
    %c1_i32 = arith.constant 1 : i32
    %0 = arith.muli %arg0, %c1_i32 : i32
    %1 = arith.addi %0, %arg1 : i32
    %c0_i32 = arith.constant 0 : i32
    %2 = arith.minsi %1, %c0_i32 : i32
    %c0_i32_0 = arith.constant 0 : i32
    %c0_i32_1 = arith.constant 0 : i32
    return %2, %c0_i32_0 : i32, i32
  }
  func.func @transform_2(%arg0: i32, %arg1: i32) -> (i32, i32, i32) {
    %c0_i32 = arith.constant 0 : i32
    %c0_i32_0 = arith.constant 0 : i32
    %c0_i32_1 = arith.constant 0 : i32
    return %arg0, %c0_i32, %c0_i32_0 : i32, i32, i32
  }
}

</mosaic_0001>

<bundles_post_ra>
// kernel: tpu_custom_call.1
= control target key start
LH: loop header
LB: loop body
LE: loop exit
PB: predicated region body
PF: predicated region fallthrough
CT: control target
= control target key end

     0   :  { %7 = vsyncpa [#allocation4], 0  ;;  %s261_s0 = inlined_call_operand.hbm [shape: f32[16,128], index: 0, kind: input, shape index: {}]   ;;  %s262_s1 = inlined_call_operand.hbm [shape: f32[16,128], index: 1, kind: input, shape index: {}]   ;;  %s263_s2 = inlined_call_operand.hbm [shape: f32[1,8,128], index: 2, kind: output, shape index: {}]  }
   0x1   :  { %8 = vsyncpa [#allocation7], 0 }
   0x2   :  { %9 = vsyncpa [#allocation5], 0  ;;  %s205_s9 = smov [#allocation3]   ;;  %s133_s13 = scalar_lea.hbm %s261_s0, 256 }
   0x3   :  { %s21_s10 = sshll.u32 %s205_s9, 4  ;;  %p134_p0 = scmp.ne.s32.totalorder %s261_s0, %s133_s13  ;;  %s22_s10 = int_to_ptr.vmem [resolvable:$true] %s21_s10 }
   0x4   :  { %p137_p1 = scmp.lt.u32.totalorder %s133_s13, %s261_s0 }
   0x6   :  { %p139_p2 = pnand %p137_p1, %p134_p0 }
   0x8   :  { %142 = shalt.err (!%p139_p2)
}
   0x9   :  { %s143_s18 = scalar_lea.vmem %s22_s10, 256  ;;  %p148_p4 = scmp.lt.s32.totalorder %s22_s10, %s22_s10 }
   0xa   :  { %p144_p3 = scmp.ne.s32.totalorder %s22_s10, %s143_s18  ;;  %p149_p5 = scmp.lt.s32.totalorder %s143_s18, %s143_s18 }
   0xc   :  { %p150_p6 = por %p149_p5, %p148_p4 }
   0xe   :  { %p151_p7 = pnand %p150_p6, %p144_p3 }
  0x10   :  { %154 = shalt.err (!%p151_p7)
}
  0x11   :  { %s206_s19 = smov 128   ;;  %s207_s20 = smov 8  }
  0x12   :  { %27 = dma.hbm_to_vmem [thread:$0]  %s261_s0, 256, %s22_s10, [#allocation4], %s206_s19, %s206_s19, %s207_s20  }
  0x13   :  { %s208_s23 = smov [#allocation6]   ;;  %s155_s27 = scalar_lea.hbm %s262_s1, 256 }
  0x14   :  { %s39_s24 = sshll.u32 %s208_s23, 4  ;;  %p156_p8 = scmp.ne.s32.totalorder %s262_s1, %s155_s27  ;;  %s40_s24 = int_to_ptr.vmem [resolvable:$true] %s39_s24 }
  0x15   :  { %p159_p9 = scmp.lt.u32.totalorder %s155_s27, %s262_s1 }
  0x17   :  { %p161_p10 = pnand %p159_p9, %p156_p8 }
  0x19   :  { %164 = shalt.err (!%p161_p10)
}
  0x1a   :  { %s165_s4 = scalar_lea.vmem %s40_s24, 256  ;;  %p170_p12 = scmp.lt.s32.totalorder %s40_s24, %s40_s24 }
  0x1b   :  { %p166_p11 = scmp.ne.s32.totalorder %s40_s24, %s165_s4  ;;  %p171_p13 = scmp.lt.s32.totalorder %s165_s4, %s165_s4 }
  0x1d   :  { %p172_p0 = por %p171_p13, %p170_p12 }
  0x1f   :  { %p173_p1 = pnand %p172_p0, %p166_p11 }
  0x21   :  { %176 = shalt.err (!%p173_p1)
}
  0x22   :  { %45 = dma.hbm_to_vmem [thread:$0]  %s262_s1, 256, %s40_s24, [#allocation7], %s206_s19, %s206_s19, %s207_s20  }
  0x23   :  { %199 = dma.done.wait [#allocation4], 256  }
  0x24   :  { %200 = vsyncadd [#allocation4], 4294967040 }
  0x25   :  { %201 = dma.done.wait [#allocation7], 256  }
  0x26   :  { %202 = vsyncadd [#allocation7], 4294967040  ;;  %v65_v0 = vld [vmem:[#allocation3] sm:$0xff]  ;;  %v66_v1 = vld [vmem:[#allocation3 + $0x8] sm:$0xff]  ;;  %s209_s6 = smov [#allocation8]  }
  0x27   :  { %v67_v2 = vld [vmem:[#allocation6] sm:$0xff]  ;;  %v68_v3 = vld [vmem:[#allocation6 + $0x8] sm:$0xff]  ;;  %s114_s7 = sshll.u32 %s209_s6, 4  ;;  %s115_s7 = int_to_ptr.vmem [resolvable:$true] %s114_s7 }
  0x28   :  { %v69_v4 = vsub.f32 %v65_v0, %v67_v2  ;;  %v70_v5 = vsub.f32 %v66_v1, %v68_v3  ;;  %s177_s8 = scalar_lea.vmem %s115_s7, 128  ;;  %p182_p3 = scmp.lt.s32.totalorder %s115_s7, %s115_s7 }
  0x29   :  { %p178_p2 = scmp.ne.s32.totalorder %s115_s7, %s177_s8  ;;  %p183_p4 = scmp.lt.s32.totalorder %s177_s8, %s177_s8 }
  0x2a   :  { %v71_v6 = vmul.f32 %v69_v4, %v69_v4  ;;  %v72_v7 = vmul.f32 %v70_v5, %v70_v5 }
  0x2b   :  { %p184_p5 = por %p183_p4, %p182_p3 }
  0x2c   :  { %v81_v8 = vadd.f32 %v72_v7, %v71_v6 }
  0x2d   :  { %p185_p6 = pnand %p184_p5, %p178_p2 }
  0x2e   :  { %v106_v9 = vmul.f32 0.00048828125, %v81_v8 }
  0x30   :  { %107 = vst [vmem:[#allocation8] sm:$0xff] %v106_v9 }
  0x31   :  { %188 = shalt.err (!%p185_p6)
}
  0x32   :  { %s189_s10 = scalar_lea.hbm %s263_s2, 128 }
  0x33   :  { %p190_p7 = scmp.ne.s32.totalorder %s263_s2, %s189_s10  ;;  %p193_p8 = scmp.lt.u32.totalorder %s189_s10, %s263_s2 }
  0x35   :  { %p195_p9 = pnand %p193_p8, %p190_p7 }
  0x37   :  { %198 = shalt.err (!%p195_p9)
}
  0x38   :  { %117 = dma.vmem_to_hbm [thread:$0]  %s115_s7, 128, %s263_s2, [#allocation5]  }
  0x39   :  { %203 = dma.done.wait [#allocation5], 128  }
  0x3a   :  { %204 = vsyncadd [#allocation5], 4294967168 }
  0x3b   :  { %121 = vsyncpa [#allocation4], 1 }
  0x3c   :  { %122 = vsyncpa [#allocation7], 1 }
  0x3d   :  { %123 = vsyncpa [#allocation5], 1 }

</bundles_post_ra>
